<compile_context>
chip_gen: v5e
topology: v5e:2x2
jax: 0.10.0
libtpu: 0.0.40
codegen_flags: <defaults>
</compile_context>

<pallas_src>
import jax
import jax.numpy as jnp
from jax.experimental import pallas as pl
from jax.experimental.pallas import tpu as pltpu

OUT_W = 8  # padded lane width for the 4-class / 3-class heads (last block dim == full dim)


# ---------------------------------------------------------------------------
# Kernels
# ---------------------------------------------------------------------------
def _infer_kernel(x_ref, w1_ref, b1_ref, ypred_ref):
    """softmax(relu(x @ w1 + b1)) over the 4 real classes, written to an 8-lane slab."""
    x = x_ref[...]                                    # (tm, D)
    w1 = w1_ref[...]                                  # (D, 8)  cols >= 4 are zero
    b1 = b1_ref[...]                                  # (1, 8)  cols >= 4 are zero

    h = jnp.dot(x, w1, preferred_element_type=jnp.float32) + b1
    h = jnp.maximum(h, 0.0)                           # (tm, 8)

    lane = jax.lax.broadcasted_iota(jnp.int32, h.shape, 1)
    hm = jnp.where(lane < 4, h, -jnp.inf)             # mask padded lanes once
    m = jnp.max(hm, axis=1, keepdims=True)
    e = jnp.exp(hm - m)                               # padded lanes -> exp(-inf) = 0
    denom = jnp.sum(e, axis=1, keepdims=True)
    ypred_ref[...] = (e / denom).astype(ypred_ref.dtype)   # exact: probs sum to 1


def _loss_kernel(x_ref, y_ref, w1_ref, b1_ref, w2_ref, b2_ref, nll_ref):
    """Fused cross-entropy: per-row NLL of relu(x@w1+b1)@w2+b2 vs label y (y<0 => padded row)."""
    x = x_ref[...]                                    # (tm, D)
    y = y_ref[...]                                    # (tm, 1) int32, -1 for padded rows
    w1 = w1_ref[...]                                  # (D, 4)
    b1 = b1_ref[...]                                  # (1, 4)
    w2 = w2_ref[...]                                  # (4, 8)  cols >= 3 are zero
    b2 = b2_ref[...]                                  # (1, 8)  cols >= 3 are zero

    h = jnp.dot(x, w1, preferred_element_type=jnp.float32) + b1
    h = jnp.maximum(h, 0.0)                           # (tm, 4)

    # K=4, N=3(+pad) matmul on the VPU: 4 broadcast multiply-adds, no MXU push/pop.
    logits = (h[:, 0:1] * w2[0:1, :]
              + h[:, 1:2] * w2[1:2, :]
              + h[:, 2:3] * w2[2:3, :]
              + h[:, 3:4] * w2[3:4, :]
              + b2)                                   # (tm, 8)

    lane = jax.lax.broadcasted_iota(jnp.int32, logits.shape, 1)
    masked = jnp.where(lane < 3, logits, -jnp.inf)    # only the 3 real classes
    m = jnp.max(masked, axis=1, keepdims=True)
    lse = m + jnp.log(jnp.sum(jnp.exp(masked - m), axis=1, keepdims=True))   # (tm, 1)

    picked = jnp.sum(jnp.where(lane == y, logits, 0.0), axis=1, keepdims=True)  # label logit

    valid_row = y >= 0                                # padded batch rows contribute 0
    nll_ref[...] = jnp.where(valid_row, lse - picked, 0.0).astype(nll_ref.dtype)


# ---------------------------------------------------------------------------
# Wrapper
# ---------------------------------------------------------------------------
def _round_up(n, m):
    return ((n + m - 1) // m) * m


def _pad_cols(a, width):
    return jnp.pad(a, ((0, 0), (0, width - a.shape[1])))


def _vmem_bytes(tm, D, loss_path):
    """Double-buffered VMEM footprint estimate (f32)."""
    if loss_path:
        per_step = (tm * D + tm) * 4                       # x + y
        per_step += (D * 4 + 4 + 4 * OUT_W + OUT_W) * 4    # w1, b1, w2, b2
        per_step += tm * 1 * 4                             # per-row NLL out
    else:
        per_step = tm * D * 4                              # x
        per_step += (D * OUT_W + OUT_W) * 4                # w1, b1
        per_step += tm * OUT_W * 4                         # probs out
    return 2 * per_step


def torchmodel_forward(x, w1, b1, w2, b2, y=None, *, tm=1024):
    """x: (B, input_size) f32; w1: (input_size, 4); b1: (1, 4); w2: (4, 3); b2: (1, 3).
    Returns softmax probs (B, 4) if y is None, else scalar mean cross-entropy loss."""
    x = x.astype(jnp.float32)
    B, D = x.shape
    loss_path = y is not None

    # --- batch tiling -------------------------------------------------------
    tm = min(tm, 2048)
    if B > 8:  # give the grid >= 2 steps so v7x megacore can shard ("parallel",)
        tm = min(tm, _round_up(pl.cdiv(B, 2), 8))
    tm = max(8, _round_up(min(tm, B), 8))
    # keep the double-buffered tile comfortably inside VMEM on every generation
    budget = 24 << 20
    while _vmem_bytes(tm, D, loss_path) > budget and tm > 8:
        tm = max(8, _round_up(tm // 2, 8))
    Bp = _round_up(B, tm)
    xp = x if Bp == B else jnp.pad(x, ((0, Bp - B), (0, 0)))
    grid = (Bp // tm,)

    vmem_limit = min(max(int(_vmem_bytes(tm, D, loss_path) * 1.5) + (2 << 20), 16 << 20),
                     48 << 20)
    cparams = pltpu.CompilerParams(dimension_semantics=("parallel",),
                                   vmem_limit_bytes=vmem_limit)

    if not loss_path:
        w1w = _pad_cols(w1, OUT_W)                    # (D, 8)
        b1w = _pad_cols(b1, OUT_W)                    # (1, 8)
        cost = pl.CostEstimate(
            flops=2 * Bp * D * OUT_W + 8 * Bp * OUT_W,
            transcendentals=Bp * OUT_W,
            bytes_accessed=4 * (Bp * D + D * OUT_W + OUT_W + Bp * OUT_W),
        )
        probs = pl.pallas_call(
            _infer_kernel,
            out_shape=jax.ShapeDtypeStruct((Bp, OUT_W), jnp.float32),
            grid=grid,
            in_specs=[
                pl.BlockSpec((tm, D), lambda i: (i, 0)),
                pl.BlockSpec((D, OUT_W), lambda i: (0, 0)),
                pl.BlockSpec((1, OUT_W), lambda i: (0, 0)),
            ],
            out_specs=pl.BlockSpec((tm, OUT_W), lambda i: (i, 0)),
            compiler_params=cparams,
            cost_estimate=cost,
        )(xp, w1w, b1w)
        return probs[:B, :4]

    # --- loss path: fully fused cross-entropy --------------------------------
    yp = jnp.pad(y.astype(jnp.int32).reshape(B, 1), ((0, Bp - B), (0, 0)),
                 constant_values=-1)                  # -1 marks padded rows
    w2w = _pad_cols(w2, OUT_W)                        # (4, 8)
    b2w = _pad_cols(b2, OUT_W)                        # (1, 8)
    cost = pl.CostEstimate(
        flops=2 * Bp * D * 4 + 2 * Bp * 4 * OUT_W + 16 * Bp * OUT_W,
        transcendentals=Bp * OUT_W + Bp,
        bytes_accessed=4 * (Bp * D + Bp + D * 4 + 4 + 4 * OUT_W + OUT_W + Bp),
    )
    nll = pl.pallas_call(
        _loss_kernel,
        out_shape=jax.ShapeDtypeStruct((Bp, 1), jnp.float32),
        grid=grid,
        in_specs=[
            pl.BlockSpec((tm, D), lambda i: (i, 0)),
            pl.BlockSpec((tm, 1), lambda i: (i, 0)),
            pl.BlockSpec((D, 4), lambda i: (0, 0)),
            pl.BlockSpec((1, 4), lambda i: (0, 0)),
            pl.BlockSpec((4, OUT_W), lambda i: (0, 0)),
            pl.BlockSpec((1, OUT_W), lambda i: (0, 0)),
        ],
        out_specs=pl.BlockSpec((tm, 1), lambda i: (i, 0)),
        compiler_params=cparams,
        cost_estimate=cost,
    )(xp, yp, w1, b1, w2w, b2w)
    # padded rows are already zero inside the kernel; mean over the real batch.
    return jnp.sum(nll) / B


# ---------------------------------------------------------------------------
# Reference (pure JAX) and parameter init
# ---------------------------------------------------------------------------
def _reference_forward(x, w1, b1, w2, b2, y=None):
    h = jnp.maximum(x @ w1 + b1, 0.0)
    if y is None:
        return jax.nn.softmax(h, axis=1)
    logits = h @ w2 + b2
    logz = logits - jax.scipy.special.logsumexp(logits, axis=1, keepdims=True)
    return -jnp.mean(jnp.take_along_axis(logz, y[:, None], axis=1))


def init_params(input_size, key):
    k1, k2, k3, k4 = jax.random.split(key, 4)
    # deterministic PyTorch-style uniform init (synthetic; no checkpoint load)
    lim1 = 1.0 / jnp.sqrt(input_size)
    w1 = jax.random.uniform(k1, (input_size, 4), jnp.float32, -lim1, lim1)
    b1 = jax.random.uniform(k2, (1, 4), jnp.float32, -lim1, lim1)
    lim2 = 1.0 / jnp.sqrt(4.0)
    w2 = jax.random.uniform(k3, (4, 3), jnp.float32, -lim2, lim2)
    b2 = jax.random.uniform(k4, (1, 3), jnp.float32, -lim2, lim2)
    return w1, b1, w2, b2


if __name__ == "__main__":
    key = jax.random.PRNGKey(0)
    kx, kp, ky = jax.random.split(key, 3)

    batch, input_size = 8, 32
    x = jax.random.normal(kx, (batch, input_size), jnp.float32)
    w1, b1, w2, b2 = init_params(input_size, kp)

    # inference path: 8-lane output slab, exact softmax normalization
    y_pred = torchmodel_forward(x, w1, b1, w2, b2)
    jax.block_until_ready(y_pred)
    assert y_pred.shape == (batch, 4)
    assert jnp.allclose(jnp.sum(y_pred, axis=1), 1.0, atol=1e-5)
    assert jnp.allclose(y_pred, _reference_forward(x, w1, b1, w2, b2), atol=1e-4)

    # loss path: fused cross-entropy, per-row NLL out of the kernel
    y = jax.random.randint(ky, (batch,), 0, 3)
    loss = torchmodel_forward(x, w1, b1, w2, b2, y=y)
    jax.block_until_ready(loss)
    assert jnp.allclose(loss, _reference_forward(x, w1, b1, w2, b2, y=y), atol=1e-4)

    # padded batch + multi-step parallel grid (tm=8 -> 3 grid steps); exercises the
    # y = -1 padded-row masking inside the fused-CE kernel.
    batch2 = 20
    x2 = jax.random.normal(kx, (batch2, input_size), jnp.float32)
    y2 = jax.random.randint(ky, (batch2,), 0, 3)
    y_pred2 = torchmodel_forward(x2, w1, b1, w2, b2, tm=8)
    loss2 = torchmodel_forward(x2, w1, b1, w2, b2, y=y2, tm=8)
    jax.block_until_ready((y_pred2, loss2))
    assert y_pred2.shape == (batch2, 4)
    assert jnp.allclose(y_pred2, _reference_forward(x2, w1, b1, w2, b2), atol=1e-4)
    assert jnp.allclose(loss2, _reference_forward(x2, w1, b1, w2, b2, y=y2), atol=1e-4)

    print("KERNEL_OK")
</pallas_src>

<mosaic_0001>
module attributes {stable_mosaic.version = 11 : i64} {
  func.func @_infer_kernel(%arg0: i32, %arg1: memref<8x32xf32, #tpu.memory_space<vmem>>, %arg2: memref<32x8xf32, #tpu.memory_space<vmem>>, %arg3: memref<1x8xf32, #tpu.memory_space<vmem>>, %arg4: memref<8x8xf32, #tpu.memory_space<vmem>>) attributes {dimension_semantics = [#tpu.dimension_semantics<parallel>], iteration_bounds = array<i64: 1>, scalar_prefetch = 0 : i64, scratch_operands = 0 : i64, tpu.core_type = #tpu.core_type<tc>, window_params = [{transform_indices = @transform_0, window_bounds = array<i64: 8, 32>}, {pipeline_mode = #tpu.pipeline_mode<synchronous>, transform_indices = @transform_1, window_bounds = array<i64: 32, 8>}, {pipeline_mode = #tpu.pipeline_mode<synchronous>, transform_indices = @transform_2, window_bounds = array<i64: 1, 8>}, {transform_indices = @transform_3, window_bounds = array<i64: 8, 8>}]} {
    %c0 = arith.constant 0 : index
    %c0_0 = arith.constant 0 : index
    %0 = vector.load %arg1[%c0, %c0_0] : memref<8x32xf32, #tpu.memory_space<vmem>>, vector<8x32xf32>
    %c0_1 = arith.constant 0 : index
    %c0_2 = arith.constant 0 : index
    %1 = vector.load %arg2[%c0_1, %c0_2] : memref<32x8xf32, #tpu.memory_space<vmem>>, vector<32x8xf32>
    %c0_3 = arith.constant 0 : index
    %c0_4 = arith.constant 0 : index
    %2 = vector.load %arg3[%c0_3, %c0_4] : memref<1x8xf32, #tpu.memory_space<vmem>>, vector<1x8xf32>
    %cst = arith.constant dense<0.000000e+00> : vector<8x8xf32>
    %3 = tpu.matmul %0, %1, %cst {dimension_numbers = #tpu.dot_dimension_numbers<[1], [0], [0], [1], [0, 0, 1, 1], [], []>} : vector<8x32xf32>, vector<32x8xf32>, vector<8x8xf32> -> vector<8x8xf32>
    %4 = vector.broadcast %2 : vector<1x8xf32> to vector<8x8xf32>
    %5 = arith.addf %3, %4 : vector<8x8xf32>
    %cst_5 = arith.constant 0.000000e+00 : f32
    %6 = vector.broadcast %cst_5 : f32 to vector<8x8xf32>
    %7 = arith.maximumf %5, %6 : vector<8x8xf32>
    %8 = tpu.iota {dimensions = array<i32: 1>} : vector<8x8xi32>
    %c4_i32 = arith.constant 4 : i32
    %9 = vector.broadcast %c4_i32 : i32 to vector<8x8xi32>
    %10 = arith.cmpi slt, %8, %9 : vector<8x8xi32>
    %cst_6 = arith.constant 0xFF800000 : f32
    %11 = vector.broadcast %cst_6 : f32 to vector<8x8xf32>
    %12 = arith.select %10, %7, %11 : vector<8x8xi1>, vector<8x8xf32>
    %cst_7 = arith.constant dense<0xFF800000> : vector<8xf32>
    %13 = vector.multi_reduction <maximumf>, %12, %cst_7 [1] : vector<8x8xf32> to vector<8xf32>
    %14 = vector.shape_cast %13 : vector<8xf32> to vector<8x1xf32>
    %15 = vector.broadcast %14 : vector<8x1xf32> to vector<8x8xf32>
    %16 = arith.subf %12, %15 : vector<8x8xf32>
    %17 = math.exp %16 : vector<8x8xf32>
    %cst_8 = arith.constant dense<0.000000e+00> : vector<8xf32>
    %18 = vector.multi_reduction <add>, %17, %cst_8 [1] : vector<8x8xf32> to vector<8xf32>
    %19 = vector.shape_cast %18 : vector<8xf32> to vector<8x1xf32>
    %20 = vector.broadcast %19 : vector<8x1xf32> to vector<8x8xf32>
    %21 = arith.divf %17, %20 : vector<8x8xf32>
    %c0_9 = arith.constant 0 : index
    %c0_10 = arith.constant 0 : index
    %22 = vector.load %arg4[%c0_9, %c0_10] : memref<8x8xf32, #tpu.memory_space<vmem>>, vector<8x8xf32>
    tpu.vector_store %arg4[%c0_9, %c0_10], %21 {strides = array<i32>} : memref<8x8xf32, #tpu.memory_space<vmem>>, vector<8x8xf32>,
    return
  }
  func.func @transform_0(%arg0: i32) -> (i32, i32) {
    %c0_i32 = arith.constant 0 : i32
    %c0_i32_0 = arith.constant 0 : i32
    return %arg0, %c0_i32 : i32, i32
  }
  func.func @transform_1(%arg0: i32) -> (i32, i32) {
    %c0_i32 = arith.constant 0 : i32
    %c0_i32_0 = arith.constant 0 : i32
    %c0_i32_1 = arith.constant 0 : i32
    return %c0_i32, %c0_i32_0 : i32, i32
  }
  func.func @transform_2(%arg0: i32) -> (i32, i32) {
    %c0_i32 = arith.constant 0 : i32
    %c0_i32_0 = arith.constant 0 : i32
    %c0_i32_1 = arith.constant 0 : i32
    return %c0_i32, %c0_i32_0 : i32, i32
  }
  func.func @transform_3(%arg0: i32) -> (i32, i32) {
    %c0_i32 = arith.constant 0 : i32
    %c0_i32_0 = arith.constant 0 : i32
    return %arg0, %c0_i32 : i32, i32
  }
}

</mosaic_0001>

<bundles_post_ra>
// kernel: tpu_custom_call.1
= control target key start
LH: loop header
LB: loop body
LE: loop exit
PB: predicated region body
PF: predicated region fallthrough
CT: control target
= control target key end

     0   :  { %s173_s0 = inlined_call_operand.vmem [shape: f32[8,32], index: 0, kind: input, shape index: {}]   ;;  %s174_s1 = inlined_call_operand.vmem [shape: f32[32,8], index: 1, kind: input, shape index: {}]   ;;  %s175_s2 = inlined_call_operand.vmem [shape: f32[1,8], index: 2, kind: input, shape index: {}]   ;;  %s176_s3 = inlined_call_operand.hbm [shape: f32[8,8], index: 3, kind: output, shape index: {}]  }
   0x1   :  { %v19_v0 = vld [vmem:[%s174_s1 + $0x18] sm:$0xff]  ;;  %v18_v1 = vld [vmem:[%s174_s1 + $0x10] sm:$0xff]  ;;  %v17_v2 = vld [vmem:[%s174_s1 + $0x8] sm:$0xff] }
   0x2   :  { %40 = vmatpush.msra.mxu0 %v19_v0 }
   0x3   :  { %8 = vsyncpa [#allocation3], 0  ;;  %v16_v3 = vld [vmem:[%s174_s1] sm:$0xff]  ;;  %vm24_vm0 = vcmask 261120   ;;  %v49_v5 = vlaneseq  ;;  %vm53_vm2 = vcmask 64512   ;;  %s86_s25 = sshll.u32 %s176_s3, 4  ;;  %s87_s25 = int_to_ptr.hbm [resolvable:$true] %s86_s25 }
   0x4   :  { %41 = vmatpush.msra.mxu0 %v18_v1  ;;  %v15_v4 = vld [vmem:[%s173_s0] sm:$0xff]  ;;  %s128_s0 = smov [#allocation2]  }
   0x5   :  { %v97_v6 = vld [vmem:[%s175_s2] ss:$0 sm:$0xff]  ;;  %v50_v7 = vand.u32 127, %v49_v5  ;;  %s84_s1 = sshll.u32 %s128_s0, 4  ;;  %s85_s1 = int_to_ptr.vmem [resolvable:$true] %s84_s1 }
   0x6   :  { %42 = vmatpush.msra.mxu0 %v17_v2 }
   0x7   :  { %vm51_vm1 = vcmp.lt.s32.totalorder %v50_v7, 4 }
   0x8   :  { %43 = vmatpush.msra.mxu0 %v16_v3 }
   0x9   :  { %95 = vmatmul.msk.f32.vlgmr.msra.gmra.mxu0 %vm24_vm0, %v15_v4 }
  0x86   :  { %v45_v8 = vpop.f32.mrf.mxu0 }
  0x87   :  { %v46_v9 = vadd.f32 %v97_v6, %v45_v8 }
  0x89   :  { %v48_v10 = vmax.f32 %v46_v9, 0.0 }
  0x8b   :  { %v52_v11 = vsel %vm51_vm1, %v48_v10, -inf }
  0x8c   :  { %v54_v12 = vsel %vm53_vm2, %v52_v11, -inf }
  0x8d   :  { %55 = vmax.xlane.f32.xlu0 %v54_v12 }
 0x100   :  { %v56_v13 = vpop.xlane.xlu0 %55 }
 0x101   :  { %v57_v14 = vsub.f32 %v52_v11, %v56_v13 }
 0x103   :  { %v58_v15 = vmul.f32 1.442695, %v57_v14 }
 0x105   :  { %98 = vpow2.f32 %v58_v15 }
 0x10b   :  { %v99_v16 = vpop.eup %98 }
 0x10c   :  { %v60_v17 = vsel %vm53_vm2, %v99_v16, 0.0 }
 0x10d   :  { %61 = vadd.xlane.f32.xlu0 %v60_v17 }
 0x180   :  { %v62_v18 = vpop.xlane.xlu0 %61 }
 0x181   :  { %100 = vrcp.f32 %v62_v18  ;;  %v74_v22 = vand.u32 2147483648, %v62_v18  ;;  %v72_v24 = vand.u32 2147483647, %v62_v18  ;;  %vm68_vm4 = vweird.f32 %v62_v18 }
 0x183   :  { %v75_v26 = vor.u32 1.1754944e-38, %v74_v22  ;;  %vm73_vm6 = vcmp.eq.f32.partialorder %v72_v24, 8.507059e+37 }
 0x187   :  { %v101_v19 = vpop.eup %100 }
 0x188   :  { %v64_v20 = vmul.f32 %v101_v19, %v62_v18  ;;  %vm69_vm3 = vweird.f32 %v101_v19 }
 0x189   :  { %vm70_vm5 = vmor %vm68_vm4, %vm69_vm3 }
 0x18a   :  { %v65_v21 = vsub.f32 1.0, %v64_v20 }
 0x18c   :  { %v66_v23 = vmul.f32 %v101_v19, %v65_v21 }
 0x18e   :  { %v67_v25 = vadd.f32 %v101_v19, %v66_v23 }
 0x190   :  { %v71_v27 = vsel %vm70_vm5, %v101_v19, %v67_v25 }
 0x191   :  { %v76_v28 = vsel %vm73_vm6, %v75_v26, %v71_v27 }
 0x192   :  { %v77_v29 = vmul.f32 %v99_v16, %v76_v28 }
 0x194   :  { %78 = vst.msk [vmem:[#allocation2] sm:$0xff] %vm53_vm2, %v77_v29 }
 0x195   :  { %89 = dma.vmem_to_hbm [thread:$0]  %s85_s1, 128, %s87_s25, [#allocation3]  }
 0x196   :  { %126 = dma.done.wait [#allocation3], 128  }
 0x197   :  { %127 = vsyncadd [#allocation3], 4294967168 }
 0x198   :  { %94 = vsyncpa [#allocation3], 1 }

</bundles_post_ra>
